<compile_context>
chip_gen: v7x
topology: tpu7x:2x2x1
jax: 0.10.0
libtpu: 0.0.40
codegen_flags: <defaults>
</compile_context>

<pallas_src>
import functools

import jax
import jax.numpy as jnp
from jax import lax
from jax.experimental import pallas as pl
from jax.experimental.pallas import tpu as pltpu


def _mlp_kernel(x_ref, w1_ref, b1_ref, w2_ref, b2_ref, w3_ref, b3_ref, ot_ref,
                *, bf16_tanh):
    # x tile: (tile_b, n_in).  Weights: PyTorch-native (out, in), already bf16.
    # Biases: (out, 1) f32.  Everything downstream is feature-major
    # (features, tile_b) -> lane-dense vregs and a lane-dense output store.
    x = x_ref[...].astype(jnp.bfloat16)   # no-op if the caller hands over bf16
    w1 = w1_ref[...]
    w2 = w2_ref[...]
    w3 = w3_ref[...]
    b1 = b1_ref[...]
    b2 = b2_ref[...]
    b3 = b3_ref[...]

    # Layer 1: contract n_in of (64, n_in) with n_in of (tile_b, n_in)
    #          -> (64, tile_b)   ("NT" matmul, transposed RHS fed to the MXU).
    nt = (((1,), (1,)), ((), ()))
    z1 = lax.dot_general(w1, x, nt, preferred_element_type=jnp.float32) + b1
    if bf16_tanh:                      # v6e / v7x: bf16-native EUP
        h1 = jnp.tanh(z1.astype(jnp.bfloat16))
    else:                              # v5e and older: keep tanh in f32
        h1 = jnp.tanh(z1).astype(jnp.bfloat16)

    # Layer 2: (32, 64) @ (64, tile_b) -> (32, tile_b)
    z2 = jnp.dot(w2, h1, preferred_element_type=jnp.float32) + b2
    if bf16_tanh:
        h2 = jnp.tanh(z2.astype(jnp.bfloat16))
    else:
        h2 = jnp.tanh(z2).astype(jnp.bfloat16)

    # Layer 3: (n_out, 32) @ (32, tile_b) -> (n_out, tile_b), lane-dense store.
    out_t = jnp.dot(w3, h2, preferred_element_type=jnp.float32) + b3
    ot_ref[...] = out_t.astype(ot_ref.dtype)


def _round_up(x, m):
    return ((x + m - 1) // m) * m


def net_forward(x, params, *, tile_b=4096):
    """Fused forward pass of Net as one Pallas call.

    x:      (B, n_in) float32 (or bfloat16 to halve the dominant HBM stream)
    params: dict with PyTorch-native layouts:
              w1 (64, n_in),  b1 (64, 1)
              w2 (32, 64),    b2 (32, 1)
              w3 (n_out, 32), b3 (n_out, 1)
    tile_b: requested batch rows per grid step (rounded to a multiple of 128;
            clamped so the grid has >= 2 tiles for v7x's two TensorCores).
    Returns (B, n_out) float32.
    """
    B, n_in = x.shape
    n_out = params["w3"].shape[0]

    # Cast the resident weights to bf16 once, outside the kernel.
    w1 = params["w1"].astype(jnp.bfloat16)
    w2 = params["w2"].astype(jnp.bfloat16)
    w3 = params["w3"].astype(jnp.bfloat16)
    b1, b2, b3 = params["b1"], params["b2"], params["b3"]
    weight_args = (w1, b1, w2, b2, w3, b3)

    # bf16 tanh only where the EUP is bf16-native (v6e / v7x).
    kind = jax.devices()[0].device_kind.lower()
    bf16_tanh = not any(v in kind for v in ("v2", "v3", "v4", "v5"))
    kernel = functools.partial(_mlp_kernel, bf16_tanh=bf16_tanh)

    out_t_shape = jax.ShapeDtypeStruct((n_out, B), jnp.float32)

    # ---- tiny-batch fast path: one block, everything resident in VMEM ----
    if B <= 256:
        vmem = pl.BlockSpec(memory_space=pltpu.MemorySpace.VMEM)
        out_t = pl.pallas_call(
            kernel,
            out_shape=out_t_shape,
            in_specs=[vmem] * 7,
            out_specs=vmem,
        )(x, *weight_args)
        return out_t.T

    # ---- large-batch path: batch-tiled grid, pipelined DMA, megacore ----
    # tile_b: multiple of 128 (lane-dense output block), big enough to amortize
    # per-step overhead, but small enough that the grid has >= 2 tiles so both
    # TensorCores get work on v7x.
    tile_b = max(128, min(_round_up(tile_b, 128), _round_up(pl.cdiv(B, 2), 128)))
    grid = (pl.cdiv(B, tile_b),)

    def resident(shape):
        # Full-shape block, constant index_map -> stays in VMEM across steps.
        return pl.BlockSpec(shape, lambda i: (0, 0))

    in_specs = [
        pl.BlockSpec((tile_b, n_in), lambda i: (i, 0)),   # streamed x tile
        resident(w1.shape), resident(b1.shape),
        resident(w2.shape), resident(b2.shape),
        resident(w3.shape), resident(b3.shape),
    ]
    out_specs = pl.BlockSpec((n_out, tile_b), lambda i: (0, i))  # lane-dense

    out_t = pl.pallas_call(
        kernel,
        out_shape=out_t_shape,
        grid=grid,
        in_specs=in_specs,
        out_specs=out_specs,
        compiler_params=pltpu.CompilerParams(
            dimension_semantics=("parallel",),   # shard batch tiles across TCs
        ),
    )(x, *weight_args)
    return out_t.T


def init_params(key, n_inputs, n_outputs):
    """Deterministic init mirroring nn.Linear's U(-1/sqrt(fan_in), ...).

    Weights are stored PyTorch-native (out, in); biases as (out, 1).
    """
    def linear(key, fan_in, fan_out):
        kw, kb = jax.random.split(key)
        bound = 1.0 / jnp.sqrt(jnp.float32(fan_in))
        w = jax.random.uniform(kw, (fan_out, fan_in), jnp.float32, -bound, bound)
        b = jax.random.uniform(kb, (fan_out, 1), jnp.float32, -bound, bound)
        return w, b

    k1, k2, k3 = jax.random.split(key, 3)
    w1, b1 = linear(k1, n_inputs, 64)
    w2, b2 = linear(k2, 64, 32)
    w3, b3 = linear(k3, 32, n_outputs)
    return dict(w1=w1, b1=b1, w2=w2, b2=b2, w3=w3, b3=b3)


def net_forward_ref(x, p):
    """Pure-JAX f32 reference (exactly nn.Linear semantics: x @ W.T + b)."""
    h1 = jnp.tanh(x @ p["w1"].T + p["b1"][:, 0])
    h2 = jnp.tanh(h1 @ p["w2"].T + p["b2"][:, 0])
    return h2 @ p["w3"].T + p["b3"][:, 0]


if __name__ == "__main__":
    key = jax.random.PRNGKey(0)
    k_p, k_a, k_b, k_c = jax.random.split(key, 4)

    n_inputs = 16
    n_outputs = 4
    params = init_params(k_p, n_inputs, n_outputs)

    # bf16 MXU operands / bf16 tanh introduce ~1e-2-level error vs f32 ref.
    ATOL = 5e-2
    RTOL = 5e-2

    # --- small batch: single-block fast path ---
    x_small = jax.random.normal(k_a, (8, n_inputs), jnp.float32)
    out_small = jax.block_until_ready(net_forward(x_small, params))
    ref_small = net_forward_ref(x_small, params)
    assert out_small.shape == (8, n_outputs)
    assert jnp.allclose(out_small, ref_small, atol=ATOL, rtol=RTOL)

    # --- mid batch, not a multiple of the tile: partial last block path ---
    x_mid = jax.random.normal(k_b, (384, n_inputs), jnp.float32)
    out_mid = jax.block_until_ready(net_forward(x_mid, params))
    ref_mid = net_forward_ref(x_mid, params)
    assert out_mid.shape == (384, n_outputs)
    assert jnp.allclose(out_mid, ref_mid, atol=ATOL, rtol=RTOL)

    # --- larger batch: tiled, pipelined, >=2 parallel tiles ---
    x_big = jax.random.normal(k_c, (1024, n_inputs), jnp.float32)
    out_big = jax.block_until_ready(net_forward(x_big, params, tile_b=4096))
    ref_big = net_forward_ref(x_big, params)
    assert out_big.shape == (1024, n_outputs)
    assert jnp.allclose(out_big, ref_big, atol=ATOL, rtol=RTOL)

    print("KERNEL_OK")
</pallas_src>

<mosaic_0001>
module attributes {stable_mosaic.version = 11 : i64} {
  func.func @_mlp_kernel(%arg0: memref<8x16xf32, #tpu.memory_space<vmem>>, %arg1: memref<64x16xbf16, #tpu.memory_space<vmem>>, %arg2: memref<64x1xf32, #tpu.memory_space<vmem>>, %arg3: memref<32x64xbf16, #tpu.memory_space<vmem>>, %arg4: memref<32x1xf32, #tpu.memory_space<vmem>>, %arg5: memref<4x32xbf16, #tpu.memory_space<vmem>>, %arg6: memref<4x1xf32, #tpu.memory_space<vmem>>, %arg7: memref<4x8xf32, #tpu.memory_space<vmem>>) attributes {dimension_semantics = [], scalar_prefetch = 0 : i64, scratch_operands = 0 : i64, tpu.core_type = #tpu.core_type<tc>} {
    %c0 = arith.constant 0 : index
    %c0_0 = arith.constant 0 : index
    %0 = vector.load %arg0[%c0, %c0_0] : memref<8x16xf32, #tpu.memory_space<vmem>>, vector<8x16xf32>
    %1 = arith.truncf %0 : vector<8x16xf32> to vector<8x16xbf16>
    %c0_1 = arith.constant 0 : index
    %c0_2 = arith.constant 0 : index
    %2 = vector.load %arg1[%c0_1, %c0_2] : memref<64x16xbf16, #tpu.memory_space<vmem>>, vector<64x16xbf16>
    %c0_3 = arith.constant 0 : index
    %c0_4 = arith.constant 0 : index
    %3 = vector.load %arg3[%c0_3, %c0_4] : memref<32x64xbf16, #tpu.memory_space<vmem>>, vector<32x64xbf16>
    %c0_5 = arith.constant 0 : index
    %c0_6 = arith.constant 0 : index
    %4 = vector.load %arg5[%c0_5, %c0_6] : memref<4x32xbf16, #tpu.memory_space<vmem>>, vector<4x32xbf16>
    %c0_7 = arith.constant 0 : index
    %c0_8 = arith.constant 0 : index
    %5 = vector.load %arg2[%c0_7, %c0_8] : memref<64x1xf32, #tpu.memory_space<vmem>>, vector<64x1xf32>
    %c0_9 = arith.constant 0 : index
    %c0_10 = arith.constant 0 : index
    %6 = vector.load %arg4[%c0_9, %c0_10] : memref<32x1xf32, #tpu.memory_space<vmem>>, vector<32x1xf32>
    %c0_11 = arith.constant 0 : index
    %c0_12 = arith.constant 0 : index
    %7 = vector.load %arg6[%c0_11, %c0_12] : memref<4x1xf32, #tpu.memory_space<vmem>>, vector<4x1xf32>
    %cst = arith.constant dense<0.000000e+00> : vector<64x8xf32>
    %8 = tpu.matmul %2, %1, %cst {dimension_numbers = #tpu.dot_dimension_numbers<[1], [1], [0], [0], [0, 0, 1, 0], [], []>} : vector<64x16xbf16>, vector<8x16xbf16>, vector<64x8xf32> -> vector<64x8xf32>
    %9 = vector.broadcast %5 : vector<64x1xf32> to vector<64x8xf32>
    %10 = arith.addf %8, %9 : vector<64x8xf32>
    %11 = arith.truncf %10 : vector<64x8xf32> to vector<64x8xbf16>
    %12 = math.tanh %11 : vector<64x8xbf16>
    %cst_13 = arith.constant dense<0.000000e+00> : vector<32x8xf32>
    %13 = tpu.matmul %3, %12, %cst_13 {dimension_numbers = #tpu.dot_dimension_numbers<[1], [0], [0], [1], [0, 0, 1, 1], [], []>} : vector<32x64xbf16>, vector<64x8xbf16>, vector<32x8xf32> -> vector<32x8xf32>
    %14 = vector.broadcast %6 : vector<32x1xf32> to vector<32x8xf32>
    %15 = arith.addf %13, %14 : vector<32x8xf32>
    %16 = arith.truncf %15 : vector<32x8xf32> to vector<32x8xbf16>
    %17 = math.tanh %16 : vector<32x8xbf16>
    %cst_14 = arith.constant dense<0.000000e+00> : vector<4x8xf32>
    %18 = tpu.matmul %4, %17, %cst_14 {dimension_numbers = #tpu.dot_dimension_numbers<[1], [0], [0], [1], [0, 0, 1, 1], [], []>} : vector<4x32xbf16>, vector<32x8xbf16>, vector<4x8xf32> -> vector<4x8xf32>
    %19 = vector.broadcast %7 : vector<4x1xf32> to vector<4x8xf32>
    %20 = arith.addf %18, %19 : vector<4x8xf32>
    %c0_15 = arith.constant 0 : index
    %c0_16 = arith.constant 0 : index
    %21 = vector.load %arg7[%c0_15, %c0_16] : memref<4x8xf32, #tpu.memory_space<vmem>>, vector<4x8xf32>
    tpu.vector_store %arg7[%c0_15, %c0_16], %20 {strides = array<i32>} : memref<4x8xf32, #tpu.memory_space<vmem>>, vector<4x8xf32>,
    return
  }
}

</mosaic_0001>

<bundles_post_ra>
// kernel: tpu_custom_call.1
= control target key start
LH: loop header
LB: loop body
LE: loop exit
PB: predicated region body
PF: predicated region fallthrough
CT: control target
= control target key end

     0   :  { %vm116_vm0 = vcmask 130048   ;;  %v466_v3 = vmov 0   ;;  %s593_s0 = inlined_call_operand.vmem [shape: f32[8,16], index: 0, kind: input, shape index: {}]   ;;  %s594_s1 = inlined_call_operand.vmem [shape: bf16[64,16], index: 1, kind: input, shape index: {}]   ;;  %s595_s2 = inlined_call_operand.vmem [shape: f32[64,1], index: 2, kind: input, shape index: {}]   ;;  %s596_s3 = inlined_call_operand.vmem [shape: bf16[32,64], index: 3, kind: input, shape index: {}]   ;;  %s597_s4 = inlined_call_operand.vmem [shape: f32[32,1], index: 4, kind: input, shape index: {}]   ;;  %s598_s5 = inlined_call_operand.vmem [shape: bf16[4,32], index: 5, kind: input, shape index: {}]   ;;  %s599_s6 = inlined_call_operand.vmem [shape: f32[4,1], index: 6, kind: input, shape index: {}]   ;;  %s600_s7 = inlined_call_operand.hbm [shape: f32[4,8], index: 7, kind: output, shape index: {}]  }
   0x1   :  { %v28_v0 = vld [vmem:[%s593_s0] sm:$0xff]  ;;  %422 = vset.pattern.permute.xlu0 %v466_v3  ;;  %423 = vset.pattern.permute.xlu1 %v466_v3  ;;  %v45_v6 = vld [vmem:[%s595_s2 + $0x10] sm:$0xff]  ;;  %v44_v7 = vld [vmem:[%s595_s2 + $0x8] sm:$0xff] }
   0x2   :  { %v29_v1 = vpack.c.bf16 %v28_v0, %v28_v0  ;;  %v424_v2 = vld [vmem:[%s594_s1] sm:$0xff]   ;;  %68 = vperm.xlu1 %423, %v45_v6   ;;  %v425_v8 = vld [vmem:[%s594_s1 + $0x8] sm:$0xff]   ;;  %v46_v9 = vld [vmem:[%s595_s2 + $0x18] sm:$0xff] }
   0x3   :  { %389 = vmatprep.mubr.msk.bf16.mxu0 %vm116_vm0, %v424_v2  ;;  %v43_v5 = vld [vmem:[%s595_s2] sm:$0xff]  ;;  %v426_v10 = vld [vmem:[%s594_s1 + $0x10] sm:$0xff]  }
   0x4   :  { %417 = vmatprep.subr.msk.bf16.mxu0 %vm116_vm0, %v29_v1  ;;  %v130_v4 = vsel %vm116_vm0, %v29_v1, 0  ;;  %58 = vperm.xlu0 %422, %v43_v5   ;;  %v47_v11 = vld [vmem:[%s595_s2 + $0x20] sm:$0xff] }
   0x5   :  { %388 = vmatpush3.bf16.xpose.msra.mxu0 %v130_v4 }
   0x6   :  { %73 = vperm.xlu1 %423, %v46_v9  }
   0x8   :  { %63 = vperm.xlu0 %422, %v44_v7  }
   0x9   :  { %12 = vsyncpa [#allocation3], 0  ;;  %v48_v12 = vld [vmem:[%s595_s2 + $0x28] sm:$0xff]  ;;  %v49_v13 = vld [vmem:[%s595_s2 + $0x30] sm:$0xff]  ;;  %vm235_vm1 = vcmask 523264   ;;  %v467_v55 = vmov 0.0  }
   0xa   :  { %83 = vperm.xlu1 %423, %v48_v12   ;;  %v427_v14 = vld [vmem:[%s594_s1 + $0x18] sm:$0xff]   ;;  %v51_v16 = vld [vmem:[%s597_s4] sm:$0xff]  ;;  %v52_v17 = vld [vmem:[%s597_s4 + $0x8] sm:$0xff]  ;;  %409 = vmatprep.subr.bf16.mxu0 %v467_v55  ;;  %vm468_vm2 = vmmov 0   ;;  %vm300_vm3 = vcmask 261120   ;;  %s469_s13 = smov [#allocation2]  }
   0xb   :  { %v50_v15 = vld [vmem:[%s595_s2 + $0x38] sm:$0xff]  ;;  %v53_v18 = vld [vmem:[%s597_s4 + $0x10] sm:$0xff]  ;;  %v55_v20 = vld [vmem:[%s599_s6] sm:$0xf]  ;;  %s352_s14 = sshll.u32 %s469_s13, 4  ;;  %vm344_vm4 = vcmask 60416   ;;  %s353_s14 = int_to_ptr.vmem [resolvable:$true] %s352_s14 }
   0xc   :  { %390 = vmatmul.mubr.msk.bf16.vlgmr.msra.gmra.mrb[0].mxu0 %vm116_vm0, %v425_v8  ;;  %78 = vperm.xlu0 %422, %v47_v11   ;;  %v54_v19 = vld [vmem:[%s597_s4 + $0x18] sm:$0xff]  ;;  %v428_v21 = vld [vmem:[%s596_s3] sm:$0xff]   ;;  %v429_v54 = vld [vmem:[%s596_s3 + $0x8] sm:$0xff]   ;;  %s442_s15 = scalar_lea.vmem %s353_s14, 64  ;;  %p447_p1 = scmp.lt.s32.totalorder %s353_s14, %s353_s14 }
   0xd   :  { %393 = vmatprep.mubr.msk.bf16.mxu0 %vm116_vm0, %v426_v10  ;;  %405 = vmatprep.mubr.msk.bf16.mxu1 %vm235_vm1, %v428_v21  ;;  %v42_v8 = vld [vmem:[%s598_s5] sm:$0x3]  ;;  %p443_p0 = scmp.ne.s32.totalorder %s353_s14, %s442_s15  ;;  %p448_p2 = scmp.lt.s32.totalorder %s442_s15, %s442_s15 }
   0xe   :  { %93 = vperm.xlu1 %423, %v50_v15  }
   0xf   :  { %p449_p3 = por %p448_p2, %p447_p1 }
  0x10   :  { %88 = vperm.xlu0 %422, %v49_v13  }
  0x11   :  { %p450_p4 = pnand %p449_p3, %p443_p0 }
  0x12   :  { %212 = vperm.xlu1 %423, %v52_v17  }
  0x14   :  { %394 = vmatmul.mubr.msk.bf16.gmra.mrb[4].mxu0 %vm116_vm0, %v427_v14  ;;  %207 = vperm.xlu0 %422, %v51_v16  }
  0x15   :  { %413 = vmatprep.mubr.msk.bf16.mxu0 %vm468_vm2, %v467_v55 }
  0x16   :  { %222 = vperm.xlu1 %423, %v54_v19  }
  0x18   :  { %217 = vperm.xlu0 %422, %v53_v18  }
  0x1c   :  { %297 = vperm.xlu0 %422, %v55_v20  }
  0x81   :  { %v69_v23 = vpop.permute.xlu1 %68 }
  0x83   :  { %v59_v22 = vpop.permute.xlu0 %58 }
  0x85   :  { %v74_v25 = vpop.permute.xlu1 %73 }
  0x87   :  { %v64_v24 = vpop.permute.xlu0 %63 }
  0x89   :  { %v84_v33 = vpop.permute.xlu1 %83 }
  0x8b   :  { %v79_v29 = vpop.permute.xlu0 %78 }
  0x8d   :  { %v94_v41 = vpop.permute.xlu1 %93 }
  0x8f   :  { %v89_v39 = vpop.permute.xlu0 %88 }
  0x91   :  { %v213_v57 = vpop.permute.xlu1 %212 }
  0x93   :  { %v208_v56 = vpop.permute.xlu0 %207 }
  0x95   :  { %v223_v61 = vpop.permute.xlu1 %222 }
  0x97   :  { %v218_v59 = vpop.permute.xlu0 %217 }
  0x9b   :  { %v298_v9 = vpop.permute.xlu0 %297 }
  0xdf   :  { %v391_v26 = vpop.f32.mrb[0].mxu0 }
  0xe0   :  { %v166_v27 = vpop.f32.mrb[1].mxu0  ;;  %v175_v30 = vadd.f32 %v391_v26, %v69_v23 }
  0xe1   :  { %v392_v28 = vpop.f32.mrb[2].mxu0  ;;  %v167_v34 = vadd.f32 %v166_v27, %v59_v22 }
  0xe2   :  { %v178_v31 = vadd.f32 %v392_v28, %v74_v25  ;;  %v169_v32 = vpop.f32.mrb[3].mxu0 }
  0xe3   :  { %v170_v35 = vadd.f32 %v169_v32, %v64_v24 }
  0xe4   :  { %v198_v36 = vpack.c.bf16 %v178_v31, %v175_v30 }
  0xe5   :  { %v197_v37 = vpack.c.bf16 %v170_v35, %v167_v34 }
  0xe7   :  { %430 = vtanh.bf16 %v197_v37  ;;  %v395_v38 = vpop.f32.mrb[4].mxu0 }
  0xe8   :  { %v182_v40 = vpop.f32.mrb[5].mxu0  ;;  %432 = vtanh.bf16 %v198_v36  ;;  %v191_v43 = vadd.f32 %v395_v38, %v89_v39 }
  0xe9   :  { %v396_v42 = vpop.f32.mrb[6].mxu0  ;;  %v183_v46 = vadd.f32 %v182_v40, %v79_v29 }
  0xea   :  { %v194_v44 = vadd.f32 %v396_v42, %v94_v41  ;;  %v185_v45 = vpop.f32.mrb[7].mxu0 }
  0xeb   :  { %v186_v47 = vadd.f32 %v185_v45, %v84_v33 }
  0xec   :  { %v200_v48 = vpack.c.bf16 %v194_v44, %v191_v43 }
  0xed   :  { %v199_v49 = vpack.c.bf16 %v186_v47, %v183_v46 }
  0xef   :  { %434 = vtanh.bf16 %v199_v49 }
  0xf0   :  { %436 = vtanh.bf16 %v200_v48 }
  0xf2   :  { %v431_v50 = vpop.eup %430 }
  0xf3   :  { %397 = vmatprep.subr.bf16.mxu1 %v431_v50  ;;  %v433_v51 = vpop.eup %432 }
  0xf4   :  { %398 = vmatpush3.bf16.msra.mxu1 %v431_v50 }
  0xf5   :  { %399 = vmatprep.subr.bf16.mxu1 %v433_v51 }
  0xf8   :  { %400 = vmatpush3.bf16.msra.mxu1 %v433_v51 }
  0xfa   :  { %v435_v52 = vpop.eup %434 }
  0xfb   :  { %401 = vmatprep.subr.bf16.mxu1 %v435_v52  ;;  %v437_v53 = vpop.eup %436 }
  0xfc   :  { %402 = vmatpush3.bf16.msra.mxu1 %v435_v52 }
  0xfd   :  { %403 = vmatprep.subr.bf16.mxu1 %v437_v53 }
 0x100   :  { %404 = vmatpush3.bf16.msra.mxu1 %v437_v53 }
 0x103   :  { %406 = vmatmul.mubr.msk.bf16.vlgmr.msra.gmra.mrb[0].mxu1 %vm235_vm1, %v429_v54 }
 0x1d6   :  { %v407_v58 = vpop.f32.mrb[0].mxu1 }
 0x1d7   :  { %v276_v60 = vpop.f32.mrb[1].mxu1  ;;  %v285_v63 = vadd.f32 %v407_v58, %v218_v59 }
 0x1d8   :  { %v408_v62 = vpop.f32.mrb[2].mxu1  ;;  %v277_v2 = vadd.f32 %v276_v60, %v208_v56 }
 0x1d9   :  { %v288_v0 = vadd.f32 %v408_v62, %v223_v61  ;;  %v279_v1 = vpop.f32.mrb[3].mxu1 }
 0x1da   :  { %v280_v3 = vadd.f32 %v279_v1, %v213_v57 }
 0x1db   :  { %v292_v4 = vpack.c.bf16 %v288_v0, %v285_v63 }
 0x1dc   :  { %v291_v5 = vpack.c.bf16 %v280_v3, %v277_v2 }
 0x1de   :  { %438 = vtanh.bf16 %v291_v5 }
 0x1df   :  { %440 = vtanh.bf16 %v292_v4 }
 0x1e9   :  { %v439_v6 = vpop.eup %438 }
 0x1ea   :  { %410 = vmatpush3.bf16.msra.mxu0 %v439_v6  ;;  %v441_v7 = vpop.eup %440 }
 0x1eb   :  { %411 = vmatprep.subr.bf16.mxu0 %v467_v55 }
 0x1ee   :  { %412 = vmatpush3.bf16.msra.mxu0 %v441_v7 }
 0x1f1   :  { %414 = vmatmul.mubr.msk.bf16.vlgmr.msra.gmra.mrb[8].mxu0 %vm300_vm3, %v42_v8 }
 0x2c4   :  { %v338_v10 = vpop.f32.mrb[8].mxu0 }
 0x2c5   :  { %v339_v11 = vadd.f32 %v338_v10, %v298_v9  ;;  %v415_v12 = vpop.f32.mrb[9].mxu0 }
 0x2c6   :  { %v341_v13 = vpop.f32.mrb[10].mxu0 }
 0x2c7   :  { %v416_v14 = vpop.f32.mrb[11].mxu0  ;;  %345 = vst.msk [vmem:[#allocation2] sm:$0xf] %vm344_vm4, %v339_v11 }
 0x2c8   :  { %453 = shalt.err (!%p450_p4)
}
 0x2c9   :  { %s454_s17 = scalar_lea.hbm %s600_s7, 64 }
 0x2ca   :  { %p455_p5 = scmp.ne.s32.totalorder %s600_s7, %s454_s17  ;;  %p458_p6 = scmp.lt.u32.totalorder %s454_s17, %s600_s7 }
 0x2cc   :  { %p460_p7 = pnand %p458_p6, %p455_p5 }
 0x2ce   :  { %463 = shalt.err (!%p460_p7)
}
 0x2cf   :  { %355 = dma.vmem_to_hbm [thread:$0]  %s353_s14, 64, %s600_s7, [#allocation3]  }
 0x2d0   :  { %464 = dma.done.wait [#allocation3], 64  }
 0x2d1   :  { %465 = vsyncadd [#allocation3], 4294967232 }
 0x2d2   :  { %359 = vsyncpa [#allocation3], 1 }

</bundles_post_ra>
